<compile_context>
chip_gen: v7x
topology: tpu7x:2x2x1
jax: 0.10.0
libtpu: 0.0.40
codegen_flags: <defaults>
</compile_context>

<pallas_src>
import jax
import jax.numpy as jnp
import numpy as np
from jax.experimental import pallas as pl
from jax.experimental.pallas import tpu as pltpu

_N = 16       # number of centers (one per DR_COMPARISON_TARGET entry)
_N_DR = 13    # number of second-difference terms that feed the mean


def _drloss_kernel(x_ref, out_ref):
    # x_ref block is (1, 16, D) in the input's native dtype; convert on load.
    x = x_ref[0].astype(jnp.float32)                        # (16, D) f32

    row = jax.lax.broadcasted_iota(jnp.int32, (_N, 1), 0)   # (16, 1)

    # x_next[i] = x[(i+1) % 16]  (XLU sublane roll; shift 15 == -1 mod 16)
    x_next = pltpu.roll(x, _N - 1, 0)                       # (16, D)
    # Fold the irregular pair (PyTorch loop idx 8: x[8] vs x[0]) into the main
    # reduction: at row 7 the "base" point is x[0] instead of x[7].
    x_base = jnp.where(row == 7, x[0:1, :], x)              # (16, D)

    diff = x_next - x_base                                  # (16, D)
    sq = jnp.sum(diff * diff, axis=1, keepdims=True)        # (16, 1)
    # dists[i], i = 0..14, in the same order as the PyTorch `dists` list
    # (row 15 is wrap-around garbage, non-negative so sqrt is NaN-free, and
    # is masked out before the mean).
    dists = jnp.sqrt(sq)                                    # (16, 1), EUP sqrt

    # Fused second difference: dr[k] = |dists[k+2] - 2*dists[k+1] + dists[k]|
    d1 = pltpu.roll(dists, _N - 1, 0)                       # dists[i+1]
    d2 = pltpu.roll(dists, _N - 2, 0)                       # dists[i+2]
    dr = jnp.abs(d2 - 2.0 * d1 + dists)                     # rows 0..12 valid

    valid = row < _N_DR
    total = jnp.sum(jnp.where(valid, dr, 0.0))              # scalar
    out_ref[0, 0] = total * jnp.float32(1e-4 / _N_DR)       # one fused constant


# TODO(synk): forward-only kernel; training use would need a custom VJP (or a
# plain-jnp twin that autodiffs), since pallas_call has no autodiff rule.
def dr_loss_batched(pred_center):
    """pred_center: (B, 16, D) array (f32 or bf16). Returns (B,) f32 losses."""
    x = jnp.asarray(pred_center)            # keep native dtype; cast in-kernel
    assert x.ndim == 3 and x.shape[1] == _N, "DRLoss expects (B, 16, D)"
    b, _, d = x.shape

    out = pl.pallas_call(
        _drloss_kernel,
        out_shape=jax.ShapeDtypeStruct((b, 1), jnp.float32),
        grid=(b,),
        in_specs=[pl.BlockSpec((1, _N, d), lambda i: (i, 0, 0))],
        out_specs=pl.BlockSpec((1, 1), lambda i: (i, 0),
                               memory_space=pltpu.MemorySpace.SMEM),
        compiler_params=pltpu.CompilerParams(
            dimension_semantics=("parallel",)),
    )(x)
    return out[:, 0]


def dr_loss(pred_center):
    """Original-module semantics: pred_center (1, 16, D) -> scalar f32 loss."""
    return dr_loss_batched(pred_center)[0]


def _dr_loss_ref(pred_center_1x16xd):
    """Pure-numpy reference mirroring the PyTorch forward (single sample)."""
    tgt = [1, 2, 3, 4, 5, 6, 7, 1234, 0, 8, 9, 10, 11, 12, 13, 14]
    x = np.asarray(pred_center_1x16xd, np.float32)[0]
    dists = []
    for idx in range(x.shape[0]):
        if idx == 7:
            continue
        d = x[idx] - x[tgt[idx]]
        dists.append(np.sqrt(np.sum(d * d)))
    ddists = [dists[i + 1] - dists[i] for i in range(len(dists) - 1)]
    dr = [abs(ddists[i + 1] - ddists[i]) for i in range(len(ddists) - 1)]
    return np.float32(0.0001) * np.mean(np.asarray(dr, np.float32))


if __name__ == "__main__":
    key = jax.random.PRNGKey(0)
    D = 32

    # 1) Original-module shape (1, 16, D), f32.
    pred_center = jax.random.normal(key, (1, _N, D), dtype=jnp.float32)
    loss = jax.block_until_ready(dr_loss(pred_center))
    ref = _dr_loss_ref(np.asarray(pred_center))
    np.testing.assert_allclose(np.asarray(loss), ref, rtol=1e-5, atol=1e-7)

    # 2) Batched (B, 16, D), f32 — one pallas_call, grid over the batch.
    kb = jax.random.split(key, 2)[1]
    batch = jax.random.normal(kb, (3, _N, D), dtype=jnp.float32)
    losses = jax.block_until_ready(dr_loss_batched(batch))
    refs = np.asarray([_dr_loss_ref(np.asarray(batch[i:i + 1]))
                       for i in range(batch.shape[0])], np.float32)
    np.testing.assert_allclose(np.asarray(losses), refs, rtol=1e-5, atol=1e-7)

    # 3) bf16 input: no wrapper upcast, converted on load inside the kernel.
    pred_bf16 = pred_center.astype(jnp.bfloat16)
    loss_bf16 = jax.block_until_ready(dr_loss(pred_bf16))
    ref_bf16 = _dr_loss_ref(np.asarray(pred_bf16).astype(np.float32))
    np.testing.assert_allclose(np.asarray(loss_bf16), ref_bf16,
                               rtol=1e-5, atol=1e-7)

    print("KERNEL_OK")
</pallas_src>

<mosaic_0001>
module attributes {stable_mosaic.version = 11 : i64} {
  func.func @_drloss_kernel(%arg0: i32, %arg1: memref<1x16x32xf32, #tpu.memory_space<vmem>>, %arg2: memref<1x1xf32, #tpu.memory_space<smem>>) attributes {dimension_semantics = [#tpu.dimension_semantics<parallel>], iteration_bounds = array<i64: 1>, scalar_prefetch = 0 : i64, scratch_operands = 0 : i64, tpu.core_type = #tpu.core_type<tc>, window_params = [{transform_indices = @transform_0, window_bounds = array<i64: 1, 16, 32>}, {transform_indices = @transform_1, window_bounds = array<i64: 1, 1>}]} {
    %c0 = arith.constant 0 : index
    %c0_0 = arith.constant 0 : index
    %c0_1 = arith.constant 0 : index
    %0 = vector.load %arg1[%c0, %c0_0, %c0_1] : memref<1x16x32xf32, #tpu.memory_space<vmem>>, vector<1x16x32xf32>
    %1 = vector.shape_cast %0 : vector<1x16x32xf32> to vector<16x32xf32>
    %2 = tpu.iota {dimensions = array<i32: 0>} : vector<16x1xi32>
    %c15_i32 = arith.constant 15 : i32
    %3 = tpu.dynamic_rotate %1 by %c15_i32 dim 0 : vector<16x32xf32>, i32 -> vector<16x32xf32>
    %c7_i32 = arith.constant 7 : i32
    %4 = vector.broadcast %c7_i32 : i32 to vector<16x1xi32>
    %5 = arith.cmpi eq, %2, %4 : vector<16x1xi32>
    %6 = vector.extract_strided_slice %1 {offsets = [0, 0], sizes = [1, 32], strides = [1, 1]} : vector<16x32xf32> to vector<1x32xf32>
    %7 = vector.shape_cast %5 : vector<16x1xi1> to vector<16x1xi1>
    %8 = vector.broadcast %7 : vector<16x1xi1> to vector<16x32xi1>
    %9 = vector.shape_cast %6 : vector<1x32xf32> to vector<1x32xf32>
    %10 = vector.broadcast %9 : vector<1x32xf32> to vector<16x32xf32>
    %11 = arith.select %8, %10, %1 : vector<16x32xi1>, vector<16x32xf32>
    %12 = arith.subf %3, %11 : vector<16x32xf32>
    %13 = arith.mulf %12, %12 : vector<16x32xf32>
    %cst = arith.constant dense<0.000000e+00> : vector<16xf32>
    %14 = vector.multi_reduction <add>, %13, %cst [1] : vector<16x32xf32> to vector<16xf32>
    %15 = vector.shape_cast %14 : vector<16xf32> to vector<16x1xf32>
    %16 = math.sqrt %15 : vector<16x1xf32>
    %c15_i32_2 = arith.constant 15 : i32
    %17 = tpu.dynamic_rotate %16 by %c15_i32_2 dim 0 : vector<16x1xf32>, i32 -> vector<16x1xf32>
    %c14_i32 = arith.constant 14 : i32
    %18 = tpu.dynamic_rotate %16 by %c14_i32 dim 0 : vector<16x1xf32>, i32 -> vector<16x1xf32>
    %cst_3 = arith.constant 2.000000e+00 : f32
    %19 = vector.broadcast %cst_3 : f32 to vector<16x1xf32>
    %20 = arith.mulf %19, %17 : vector<16x1xf32>
    %21 = arith.subf %18, %20 : vector<16x1xf32>
    %22 = arith.addf %21, %16 : vector<16x1xf32>
    %23 = math.absf %22 : vector<16x1xf32>
    %c13_i32 = arith.constant 13 : i32
    %24 = vector.broadcast %c13_i32 : i32 to vector<16x1xi32>
    %25 = arith.cmpi slt, %2, %24 : vector<16x1xi32>
    %cst_4 = arith.constant 0.000000e+00 : f32
    %26 = vector.broadcast %cst_4 : f32 to vector<16x1xf32>
    %27 = arith.select %25, %23, %26 : vector<16x1xi1>, vector<16x1xf32>
    %28 = vector.shape_cast %27 : vector<16x1xf32> to vector<1x16x1xf32>
    %cst_5 = arith.constant dense<0.000000e+00> : vector<1xf32>
    %29 = vector.multi_reduction <add>, %28, %cst_5 [1, 2] : vector<1x16x1xf32> to vector<1xf32>
    %30 = vector.shape_cast %29 : vector<1xf32> to vector<1x1x1xf32>
    %31 = vector.extract %30[0, 0, 0] : f32 from vector<1x1x1xf32>
    %cst_6 = arith.constant 7.69230792E-6 : f32
    %32 = arith.mulf %31, %cst_6 : f32
    %c0_7 = arith.constant 0 : index
    %c0_8 = arith.constant 0 : index
    %33 = memref.load %arg2[%c0_7, %c0_8] : memref<1x1xf32, #tpu.memory_space<smem>>
    memref.store %32, %arg2[%c0_7, %c0_8] : memref<1x1xf32, #tpu.memory_space<smem>>
    return
  }
  func.func @transform_0(%arg0: i32) -> (i32, i32, i32) {
    %c0_i32 = arith.constant 0 : i32
    %c0_i32_0 = arith.constant 0 : i32
    %c0_i32_1 = arith.constant 0 : i32
    return %arg0, %c0_i32, %c0_i32_0 : i32, i32, i32
  }
  func.func @transform_1(%arg0: i32) -> (i32, i32) {
    %c0_i32 = arith.constant 0 : i32
    %c0_i32_0 = arith.constant 0 : i32
    return %arg0, %c0_i32 : i32, i32
  }
}

</mosaic_0001>

<bundles_post_ra>
// kernel: tpu_custom_call.1
= control target key start
LH: loop header
LB: loop body
LE: loop exit
PB: predicated region body
PF: predicated region fallthrough
CT: control target
= control target key end

     0   :  { %6 = vsyncpa [#allocation3], 0  ;;  %s209_s0 = inlined_call_operand.hbm [shape: f32[1,16,32], index: 0, kind: input, shape index: {}]   ;;  %s210_s1 = inlined_call_operand.hbm [shape: f32[1,1], index: 1, kind: output, shape index: {}]  }
   0x1   :  { %7 = vsyncpa [#allocation4], 0  ;;  %s167_s6 = smov [#allocation2]   ;;  %s131_s10 = scalar_lea.hbm %s209_s0, 256 }
   0x2   :  { %s13_s7 = sshll.u32 %s167_s6, 4  ;;  %p132_p0 = scmp.ne.s32.totalorder %s209_s0, %s131_s10  ;;  %s14_s7 = int_to_ptr.vmem [resolvable:$true] %s13_s7 }
   0x3   :  { %p135_p1 = scmp.lt.u32.totalorder %s131_s10, %s209_s0 }
   0x5   :  { %p137_p2 = pnand %p135_p1, %p132_p0 }
   0x7   :  { %140 = shalt.err (!%p137_p2)
}
   0x8   :  { %s141_s15 = scalar_lea.vmem %s14_s7, 256  ;;  %p146_p4 = scmp.lt.s32.totalorder %s14_s7, %s14_s7 }
   0x9   :  { %p142_p3 = scmp.ne.s32.totalorder %s14_s7, %s141_s15  ;;  %p147_p5 = scmp.lt.s32.totalorder %s141_s15, %s141_s15 }
   0xb   :  { %p148_p6 = por %p147_p5, %p146_p4 }
   0xd   :  { %p149_p7 = pnand %p148_p6, %p142_p3 }
   0xf   :  { %152 = shalt.err (!%p149_p7)
}
  0x10   :  { %s168_s16 = smov 128   ;;  %s169_s17 = smov 8  }
  0x11   :  { %19 = dma.hbm_to_vmem [thread:$0]  %s209_s0, 256, %s14_s7, [#allocation3], %s168_s16, %s168_s16, %s169_s17  }
  0x12   :  { %163 = dma.done.wait [#allocation3], 256  }
  0x13   :  { %164 = vsyncadd [#allocation3], 4294967040  ;;  %v25_v0 = vlaneseq  ;;  %v23_v3 = vld [vmem:[#allocation2] sm:$0xff]  ;;  %v24_v4 = vld [vmem:[#allocation2 + $0x8] sm:$0xff]  ;;  %vm49_vm2 = vcmask 261120   ;;  %vm91_vm9 = vcmask 7168  }
  0x14   :  { %v28_v5 = vrot.slane %v23_v3, 1  ;;  %v29_v6 = vrot.slane %v24_v4, 1  ;;  %s153_s23 = scalar_lea.hbm %s210_s1, 16 }
  0x15   :  { %v26_v1 = vshrl.u32 %v25_v0, 7  ;;  %p154_p8 = scmp.ne.s32.totalorder %s210_s1, %s153_s23  ;;  %p157_p9 = scmp.lt.u32.totalorder %s153_s23, %s210_s1 }
  0x17   :  { %v41_v2 = vsub.s32 0, %v26_v1  ;;  %vm30_vm0 = vcmp.lt.s32.totalorder %v26_v1, 7  ;;  %vm33_vm1 = vcmp.eq.s32.totalorder %v26_v1, 7  ;;  %vm76_vm7 = vcmp.lt.s32.totalorder %v26_v1, 6  ;;  %p159_p10 = pnand %p157_p9, %p154_p8 }
  0x18   :  { %v31_v8 = vsel %vm30_vm0, %v28_v5, %v29_v6  ;;  %v32_v10 = vsel %vm30_vm0, %v29_v6, %v28_v5  ;;  %v27_v37 = vadd.s32 8, %v26_v1 }
  0x19   :  { %v42_v7 = vrot.slane %v23_v3, %v41_v2  ;;  %v46_v12 = vsub.f32 %v32_v10, %v24_v4 }
  0x1a   :  { %vm88_vm8 = vcmp.lt.s32.totalorder %v27_v37, 13 }
  0x1b   :  { %v43_v9 = vsel %vm33_vm1, %v42_v7, %v23_v3  ;;  %v48_v14 = vmul.f32 %v46_v12, %v46_v12 }
  0x1c   :  { %v45_v11 = vsub.f32 %v31_v8, %v43_v9 }
  0x1d   :  { %v53_v16 = vsel %vm49_vm2, %v48_v14, 0.0 }
  0x1e   :  { %v47_v13 = vmul.f32 %v45_v11, %v45_v11 }
  0x20   :  { %v50_v15 = vsel %vm49_vm2, %v47_v13, 0.0 }
  0x21   :  { %51 = vadd.xlane.f32.xlu0 %v50_v15 }
  0x25   :  { %54 = vadd.xlane.f32.xlu0 %v53_v16 }
  0xae   :  { %v52_v17 = vpop.xlane.xlu0 %51 }
  0xaf   :  { %127 = vrsqrt.f32 %v52_v17  ;;  %vm58_vm3 = vcmp.eq.f32.partialorder %v52_v17, inf  ;;  %v61_v23 = vand.u32 2147483648, %v52_v17  ;;  %vm60_vm4 = vcmp.eq.f32.partialorder %v52_v17, 0.0 }
  0xb2   :  { %v55_v18 = vpop.xlane.xlu0 %54 }
  0xb3   :  { %129 = vrsqrt.f32 %v55_v18  ;;  %vm65_vm5 = vcmp.eq.f32.partialorder %v55_v18, inf  ;;  %v68_v25 = vand.u32 2147483648, %v55_v18  ;;  %vm67_vm6 = vcmp.eq.f32.partialorder %v55_v18, 0.0 }
  0xb9   :  { %v128_v19 = vpop.eup %127 }
  0xba   :  { %v57_v20 = vmul.f32 %v128_v19, %v52_v17 }
  0xbc   :  { %v59_v21 = vsel %vm58_vm3, %v52_v17, %v57_v20 }
  0xbd   :  { %v130_v22 = vpop.eup %129  ;;  %v62_v26 = vsel %vm60_vm4, %v61_v23, %v59_v21 }
  0xbe   :  { %v64_v24 = vmul.f32 %v130_v22, %v55_v18  ;;  %v70_v29 = vrot.slane %v62_v26, 1  ;;  %v74_v34 = vrot.slane %v62_v26, 2 }
  0xc0   :  { %v66_v27 = vsel %vm65_vm5, %v55_v18, %v64_v24 }
  0xc1   :  { %v69_v28 = vsel %vm67_vm6, %v68_v25, %v66_v27 }
  0xc2   :  { %v71_v30 = vrot.slane %v69_v28, 1  ;;  %v75_v31 = vrot.slane %v69_v28, 2 }
  0xc4   :  { %v72_v32 = vsel %vm30_vm0, %v70_v29, %v71_v30  ;;  %v73_v33 = vsel %vm30_vm0, %v71_v30, %v70_v29  ;;  %v77_v38 = vsel %vm76_vm7, %v74_v34, %v75_v31  ;;  %v78_v39 = vsel %vm76_vm7, %v75_v31, %v74_v34 }
  0xc5   :  { %v79_v35 = vmul.f32 2.0, %v72_v32  ;;  %v80_v36 = vmul.f32 2.0, %v73_v33 }
  0xc7   :  { %v81_v40 = vsub.f32 %v77_v38, %v79_v35  ;;  %v82_v41 = vsub.f32 %v78_v39, %v80_v36 }
  0xc9   :  { %v83_v42 = vadd.f32 %v81_v40, %v62_v26  ;;  %v84_v43 = vadd.f32 %v82_v41, %v69_v28 }
  0xcb   :  { %v85_v44 = vand.u32 2147483647, %v83_v42  ;;  %v86_v45 = vand.u32 2147483647, %v84_v43 }
  0xcd   :  { %v90_v46 = vsel %vm88_vm8, %v86_v45, 0.0  ;;  %v92_v47 = vsel %vm91_vm9, %v85_v44, 0.0 }
  0xce   :  { %v93_v48 = vsel %vm91_vm9, %v90_v46, 0.0 }
  0xcf   :  { %v94_v49 = vadd.f32 %v93_v48, %v92_v47 }
  0xd1   :  { %95 = vadd.xlane.f32.xlu1 %v94_v49 }
 0x15e   :  { %v96_v50 = vpop.xlane.xlu1 %95 }
 0x15f   :  { %v97_v51 = vrot.slane %v96_v50, 4 }
 0x161   :  { %v98_v52 = vadd.f32 %v97_v51, %v96_v50 }
 0x163   :  { %v99_v53 = vrot.slane %v98_v52, 2 }
 0x165   :  { %v100_v54 = vadd.f32 %v99_v53, %v98_v52 }
 0x167   :  { %v101_v55 = vrot.slane %v100_v54, 1 }
 0x169   :  { %v102_v56 = vadd.f32 %v101_v55, %v100_v54 }
 0x16b   :  { %121 = vpush %v102_v56 }
 0x19c   :  { %s122_s0 = spop %121 }
 0x19d   :  { %s104_s20 = smul.f32 7.692308e-06, %s122_s0 }
 0x19f   :  { %106 = sst [smem:[#allocation5]] %s104_s20 }
 0x1a0   :  { %162 = shalt.err (!%p159_p10)
}
 0x1a1   :  { %s170_s28 = smov [#allocation5]  }
 0x1a2   :  { %114 = dma.smem_to_hbm %s170_s28, 16, %s210_s1, [#allocation4]  }
 0x1a3   :  { %165 = dma.done.wait [#allocation4], 16  }
 0x1a4   :  { %166 = vsyncadd [#allocation4], 4294967280 }
 0x1a5   :  { %118 = sfence }
 0x1a6   :  { %119 = vsyncpa [#allocation3], 1 }
 0x1a7   :  { %120 = vsyncpa [#allocation4], 1 }

</bundles_post_ra>
